<compile_context>
chip_gen: v5e
topology: v5e:2x2
jax: 0.10.0
libtpu: 0.0.40
codegen_flags: <defaults>
</compile_context>

<pallas_src>
import jax
import jax.numpy as jnp
from jax.experimental import pallas as pl
from jax.experimental.pallas import tpu as pltpu

_LANES = 128           # lane width of a vreg: keep the last dim lane-dense
_MAX_TILE_ROWS = 4096  # (4096, 128) f32 tile = 2 MiB; 2x in + 2x out buffers
                       # = 8 MiB -> inside v5e's 16 MiB default scoped VMEM,
                       # well inside v6e/v7x's 32 MiB default (64 MiB
                       # physical on v7x).


def _copy_kernel(x_ref, o_ref):
    # Trivial elementwise hot path: stage the VMEM tile through unchanged.
    # Concrete losses replace this body with real compute on the tile.
    o_ref[...] = x_ref[...]


def _pallas_identity_2d(x2d, tile_rows):
    """Pipelined pass-through of a lane-dense (rows, 128) slab.

    The grid uses cdiv so the last block may be ragged; Pallas masks the
    out-of-bounds portion of the final tile, so no divisibility padding of
    the row count is required.
    """
    R, C = x2d.shape
    assert C == _LANES and tile_rows % 8 == 0
    itemsize = jnp.dtype(x2d.dtype).itemsize
    return pl.pallas_call(
        _copy_kernel,
        out_shape=jax.ShapeDtypeStruct((R, C), x2d.dtype),
        grid=(pl.cdiv(R, tile_rows),),
        in_specs=[pl.BlockSpec((tile_rows, C), lambda i: (i, 0))],
        out_specs=pl.BlockSpec((tile_rows, C), lambda i: (i, 0)),
        # Pure mem-bound copy: tell XLA's scheduler so neighbors overlap.
        cost_estimate=pl.CostEstimate(
            flops=0,
            transcendentals=0,
            bytes_accessed=2 * R * C * itemsize,
        ),
        compiler_params=pltpu.CompilerParams(
            dimension_semantics=("parallel",),  # shards across v7x's 2 TCs
        ),
    )(x2d)


@jax.jit
def _pallas_passthrough(x):
    """Flatten any array to a lane-dense (rows, 128) slab, stage it through a
    tiled/pipelined Pallas kernel, and restore the original shape.

    Common path (n % 128 == 0): zero padding, zero slicing -- a single HBM
    read + write inside the kernel. Ragged path pads at most 127 elements.
    """
    orig_shape = x.shape
    n = x.size
    flat = x.reshape(-1)

    rem = n % _LANES
    if rem:
        # Rare ragged tail (< 128 elems): pad one partial lane row only.
        flat = jnp.pad(flat, (0, _LANES - rem))
    rows = flat.size // _LANES

    # Tile rows: multiple of 8 (sublane), capped so four pipeline buffers
    # stay inside the smallest (v5e) default scoped-VMEM budget.
    tile_rows = min(_MAX_TILE_ROWS, ((rows + 7) // 8) * 8)

    x2d = flat.reshape(rows, _LANES)
    y2d = _pallas_identity_2d(x2d, tile_rows)

    y = y2d.reshape(-1)
    if rem:
        y = y[:n]
    return y.reshape(orig_shape)


class CustomLoss:
    """JAX/Pallas mirror of the abstract PyTorch CustomLoss base class."""

    def __init__(self, device=None):
        self.device = device

    def forward(self, *args, **kw):
        # Matches the reference exactly: the base class defines no loss.
        raise NotImplementedError

    def __call__(self, *args, **kw):
        return self.forward(*args, **kw)

    def to(self, device, *args, **kw):
        self.device = device
        return self


if __name__ == "__main__":
    key = jax.random.PRNGKey(0)
    # Small synthetic input consistent with a typical loss call signature.
    x = jax.random.normal(key, (2, 4, 16, 16), dtype=jnp.float32)

    loss_mod = CustomLoss().to(jax.devices()[0])

    # Verify the abstract forward behaves exactly like the reference.
    try:
        loss_mod(x)
        raise AssertionError("CustomLoss.forward should raise NotImplementedError")
    except NotImplementedError:
        pass

    # Exercise the lane-dense, pipelined Pallas pass-through scaffold
    # (128-aligned path: no pad, no slice).
    y = _pallas_passthrough(x)
    jax.block_until_ready(y)
    assert y.shape == x.shape
    assert jnp.allclose(y, x), "Pallas pass-through kernel mismatch"

    # Also exercise the ragged-tail path (n % 128 != 0) once for coverage.
    x_ragged = jax.random.normal(key, (3, 5, 7), dtype=jnp.float32)
    y_ragged = _pallas_passthrough(x_ragged)
    jax.block_until_ready(y_ragged)
    assert jnp.allclose(y_ragged, x_ragged), "Ragged-tail path mismatch"

    print("KERNEL_OK")
</pallas_src>

<mosaic_0001>
module attributes {stable_mosaic.version = 11 : i64} {
  func.func @_copy_kernel(%arg0: i32, %arg1: memref<16x128xf32, #tpu.memory_space<vmem>>, %arg2: memref<16x128xf32, #tpu.memory_space<vmem>>) attributes {dimension_semantics = [#tpu.dimension_semantics<parallel>], iteration_bounds = array<i64: 1>, scalar_prefetch = 0 : i64, scratch_operands = 0 : i64, tpu.core_type = #tpu.core_type<tc>, window_params = [{transform_indices = @transform_0, window_bounds = array<i64: 16, 128>}, {transform_indices = @transform_1, window_bounds = array<i64: 16, 128>}]} {
    %c0 = arith.constant 0 : index
    %c0_0 = arith.constant 0 : index
    %0 = vector.load %arg1[%c0, %c0_0] : memref<16x128xf32, #tpu.memory_space<vmem>>, vector<16x128xf32>
    %c0_1 = arith.constant 0 : index
    %c0_2 = arith.constant 0 : index
    %1 = vector.load %arg2[%c0_1, %c0_2] : memref<16x128xf32, #tpu.memory_space<vmem>>, vector<16x128xf32>
    tpu.vector_store %arg2[%c0_1, %c0_2], %0 {strides = array<i32>} : memref<16x128xf32, #tpu.memory_space<vmem>>, vector<16x128xf32>,
    return
  }
  func.func @transform_0(%arg0: i32) -> (i32, i32) {
    %c0_i32 = arith.constant 0 : i32
    %c0_i32_0 = arith.constant 0 : i32
    return %arg0, %c0_i32 : i32, i32
  }
  func.func @transform_1(%arg0: i32) -> (i32, i32) {
    %c0_i32 = arith.constant 0 : i32
    %c0_i32_0 = arith.constant 0 : i32
    return %arg0, %c0_i32 : i32, i32
  }
}

</mosaic_0001>

<bundles_post_ra>
// kernel: _pallas_passthrough.1
= control target key start
LH: loop header
LB: loop body
LE: loop exit
PB: predicated region body
PF: predicated region fallthrough
CT: control target
= control target key end

     0   :  { %s38_s0 = inlined_call_operand.vmem [shape: f32[16,128], index: 0, kind: input, shape index: {}]   ;;  %s39_s1 = inlined_call_operand.vmem [shape: f32[16,128], index: 1, kind: output, shape index: {}]  }
   0x1   :  { %v8_v0 = vld [vmem:[%s38_s0] sm:$0xff]  ;;  %v9_v1 = vld [vmem:[%s38_s0 + $0x8] sm:$0xff] }
   0x2   :  { %10 = vst [vmem:[%s39_s1] sm:$0xff] %v8_v0 }
   0x3   :  { %11 = vst [vmem:[%s39_s1 + $0x8] sm:$0xff] %v9_v1 }

</bundles_post_ra>
